<compile_context>
chip_gen: v5e
topology: v5e:2x2
jax: 0.10.0
libtpu: 0.0.40
codegen_flags: <defaults>
</compile_context>

<pallas_src>
import math
import functools

import jax
import jax.numpy as jnp
from jax.experimental import pallas as pl
from jax.experimental.pallas import tpu as pltpu


# ----------------------------------------------------------------------------
# Kernels
# ----------------------------------------------------------------------------
def _flash_attn_kernel(q_ref, k_ref, v_ref, o_ref,
                       qs_sc, m_sc, l_sc, acc_sc, *, scale, hb, dv):
    """Online-softmax attention, `hb` heads per step.

    grid = (head-groups, q-tiles, kv-tiles)        (kv last, "arbitrary")
      q_ref: (1, hb, tq, dk)   k_ref: (1, hb, tk, dk)   v_ref: (1, hb, tk, dv)
      o_ref: (1, tq, hb*dv)    <- lane-dense output slab
    scratch: qs (hb,tq,dk) input dtype; m,l (hb,tq,1) f32; acc (tq, hb*dv) f32.
    """
    kv = pl.program_id(2)

    @pl.when(kv == 0)
    def _():
        # Hoist q*scale out of the kv loop (reused for every kv step).
        qs_sc[...] = (q_ref[0] * scale).astype(qs_sc.dtype)
        m_sc[...] = jnp.full(m_sc.shape, -jnp.inf, dtype=m_sc.dtype)
        l_sc[...] = jnp.zeros(l_sc.shape, dtype=l_sc.dtype)
        acc_sc[...] = jnp.zeros(acc_sc.shape, dtype=acc_sc.dtype)

    q = qs_sc[...]                  # (hb, tq, dk)  already scaled, input dtype
    k = k_ref[0]                    # (hb, tk, dk)
    v = v_ref[0]                    # (hb, tk, dv)

    # s[h] = (scale*q[h]) @ k[h]^T  on the MXU, f32 accumulation, no explicit k.T
    s = jnp.einsum("hqd,hkd->hqk", q, k,
                   preferred_element_type=jnp.float32)        # (hb, tq, tk)

    m_prev = m_sc[...]                                        # (hb, tq, 1)
    m_new = jnp.maximum(m_prev, jnp.max(s, axis=-1, keepdims=True))
    alpha = jnp.exp(m_prev - m_new)                           # rescale factor
    p = jnp.exp(s - m_new)                                    # (hb, tq, tk) f32

    l_sc[...] = alpha * l_sc[...] + jnp.sum(p, axis=-1, keepdims=True)
    m_sc[...] = m_new

    # Per-head accumulate into a lane-dense (tq, hb*dv) accumulator so the final
    # store is a single unmasked, >=128-lane-wide write.
    p_in = p.astype(v.dtype)
    for h in range(hb):                                       # static unroll
        lo = h * dv
        acc_sc[:, lo:lo + dv] = (
            alpha[h] * acc_sc[:, lo:lo + dv]
            + jnp.dot(p_in[h], v[h], preferred_element_type=jnp.float32))

    @pl.when(kv == pl.num_programs(2) - 1)
    def _():
        inv_l = 1.0 / l_sc[...]                               # exact, once per q tile
        for h in range(hb):
            lo = h * dv
            acc_sc[:, lo:lo + dv] = acc_sc[:, lo:lo + dv] * inv_l[h]
        o_ref[0] = acc_sc[...].astype(o_ref.dtype)            # one lane-dense store


def _attn_with_score_kernel(q_ref, k_ref, v_ref, o_ref, s_ref, *, scale):
    """return_score=True path: materializes the normalized score per q tile."""
    q = q_ref[0] * scale            # (tq, dk), input dtype
    k = k_ref[0]                    # (Lk, dk)
    v = v_ref[0]                    # (Lk, dv)

    s = jnp.einsum("qd,kd->qk", q, k,
                   preferred_element_type=jnp.float32)        # (tq, Lk)
    m = jnp.max(s, axis=-1, keepdims=True)
    e = jnp.exp(s - m)
    # Exact normalization: the materialized scores must row-sum to 1.
    p = e / jnp.sum(e, axis=-1, keepdims=True)

    o_ref[0] = jnp.dot(p.astype(v.dtype), v,
                       preferred_element_type=jnp.float32).astype(o_ref.dtype)
    s_ref[0] = p.astype(s_ref.dtype)


# ----------------------------------------------------------------------------
# Tiling helpers
# ----------------------------------------------------------------------------
def _divisors(n):
    return [d for d in range(1, n + 1) if n % d == 0]


def _tile_candidates(n, cap):
    """Legal tile sizes, descending: multiple-of-8 divisors <= cap, plus full extent."""
    cands = {t for t in (1024, 512, 256, 128, 64, 32, 16, 8)
             if t <= min(n, cap) and n % t == 0}
    if n <= cap:
        cands.add(n)                               # full extent is always legal
    cands = sorted(cands, reverse=True)
    return cands if cands else [n]


def _vmem_limit_bytes(default=32 << 20):
    """Scoped-VMEM allowance: ~75% of physical (96 MiB v5e/v6e, 48 MiB v7x)."""
    try:
        cap = pltpu.get_tpu_info().vmem_capacity_bytes
    except Exception:                              # interpret mode / non-TPU backend
        return default
    return max(default, min((cap * 3) // 4, 96 << 20))


def _choose_flash_tiling(BH, Lq, Lk, dk, dv, itemsize, budget, cap_q, cap_k):
    """Pick (hb, tq, tk): heads per step + q/kv tiles — biggest that fit the budget."""
    def fits(hb, tq, tk):
        bufs = 2 * (hb * tq * dk + hb * tk * dk + hb * tk * dv
                    + tq * hb * dv) * itemsize                # double-buffered blocks
        scratch = hb * tq * dk * itemsize + 2 * hb * tq * 4 + tq * hb * dv * 4
        interm = int(2.5 * hb * tq * tk * 4)                  # s/p f32 temporaries
        return bufs + scratch + interm <= budget

    hb_cands = [d for d in _divisors(BH) if d <= 8]
    # Smallest head block that makes the output slab >= 128 lanes wide.
    hb = next((d for d in hb_cands if d * dv >= 128), hb_cands[-1])
    tq_cands = _tile_candidates(Lq, cap_q)
    tk_cands = _tile_candidates(Lk, cap_k)

    while True:
        for tq in tq_cands:                        # big tq first: fewer K/V re-streams
            for tk in tk_cands:
                if fits(hb, tq, tk):
                    return hb, tq, tk
        if hb == 1:
            return 1, tq_cands[-1], tk_cands[-1]
        hb = max(d for d in hb_cands if d < hb)


def _choose_score_tile(Lq, Lk, dk, dv, itemsize, budget, cap_q):
    """q-tile for the return_score path (full-extent K/V, (tq, Lk) f32 intermediates)."""
    cands = _tile_candidates(Lq, cap_q)
    for tq in cands:
        bufs = 2 * (tq * dk + Lk * dk + Lk * dv + tq * dv + tq * Lk) * itemsize
        interm = 3 * tq * Lk * 4
        if bufs + interm <= budget:
            return tq
    return cands[-1]


# ----------------------------------------------------------------------------
# Wrapper
# ----------------------------------------------------------------------------
def attention(k, q, v, scale=None, return_score=False, dropout=0.0,
              block_q=1024, block_k=1024):
    """Pallas equivalent of Attention.forward(k, q, v, scale, return_score, dropout)."""
    assert dropout == 0.0, "dropout > 0 not supported in this Pallas port"
    assert q.ndim in (3, 4) and q.ndim == k.ndim == v.ndim
    assert q.shape[-1] == k.shape[-1], "q/k head dims differ"
    assert k.shape[-2] == v.shape[-2], "k/v sequence lengths differ"
    assert q.shape[:-2] == k.shape[:-2] == v.shape[:-2], "batch/head dims differ"

    squeeze_head = q.ndim == 3
    if squeeze_head:                                # (B, Ls, D) -> (B, 1, Ls, D)
        k, q, v = k[:, None], q[:, None], v[:, None]

    B, H, Lq, dk = q.shape
    Lk = k.shape[-2]
    dv = v.shape[-1]
    scale = float(scale) if scale is not None else 1.0 / math.sqrt(k.shape[-1])

    BH = B * H
    itemsize = jnp.dtype(q.dtype).itemsize
    vmem_limit = _vmem_limit_bytes()
    budget = (vmem_limit * 3) // 4

    io_bytes = (q.size + k.size + v.size + BH * Lq * dv) * itemsize
    flops = 2 * BH * Lq * Lk * (dk + dv)
    transcendentals = BH * Lq * Lk

    if not return_score:
        hb, tq, tk = _choose_flash_tiling(BH, Lq, Lk, dk, dv, itemsize, budget,
                                          block_q, block_k)
        # v7x megacore: keep >= 2 parallel grid steps when possible.
        if (BH // hb) * (Lq // tq) < 2 and hb > 1:
            for d in sorted(_divisors(BH), reverse=True):
                if d < hb and (BH // d) * (Lq // tq) >= 2:
                    hb = d
                    break
        hg = BH // hb

        qf = q.reshape(hg, hb, Lq, dk)
        kf = k.reshape(hg, hb, Lk, dk)
        vf = v.reshape(hg, hb, Lk, dv)

        out = pl.pallas_call(
            functools.partial(_flash_attn_kernel, scale=scale, hb=hb, dv=dv),
            out_shape=jax.ShapeDtypeStruct((hg, Lq, hb * dv), q.dtype),
            grid_spec=pltpu.PrefetchScalarGridSpec(
                num_scalar_prefetch=0,
                grid=(hg, Lq // tq, Lk // tk),
                in_specs=[
                    pl.BlockSpec((1, hb, tq, dk), lambda g, qi, ki: (g, 0, qi, 0)),
                    pl.BlockSpec((1, hb, tk, dk), lambda g, qi, ki: (g, 0, ki, 0)),
                    pl.BlockSpec((1, hb, tk, dv), lambda g, qi, ki: (g, 0, ki, 0)),
                ],
                out_specs=pl.BlockSpec((1, tq, hb * dv),
                                       lambda g, qi, ki: (g, qi, 0)),
                scratch_shapes=[
                    pltpu.VMEM((hb, tq, dk), q.dtype),       # scaled q (hoisted)
                    pltpu.VMEM((hb, tq, 1), jnp.float32),    # running max m
                    pltpu.VMEM((hb, tq, 1), jnp.float32),    # running denom l
                    pltpu.VMEM((tq, hb * dv), jnp.float32),  # lane-dense accumulator
                ],
            ),
            compiler_params=pltpu.CompilerParams(
                dimension_semantics=("parallel", "parallel", "arbitrary"),
                vmem_limit_bytes=vmem_limit),
            cost_estimate=pl.CostEstimate(
                flops=flops, transcendentals=transcendentals,
                bytes_accessed=io_bytes),
        )(qf, kf, vf)

        # (hg, Lq, hb, dv) -> (hg, hb, Lq, dv) -> (B, H, Lq, dv): layout plumbing only.
        out = out.reshape(hg, Lq, hb, dv).transpose(0, 2, 1, 3).reshape(B, H, Lq, dv)
        if squeeze_head:
            out = out[:, 0]
        return out

    # return_score=True: score must be materialized -> tile only the q axis,
    # with tq sized against the VMEM budget (full K/V + (tq, Lk) intermediates).
    tq = _choose_score_tile(Lq, Lk, dk, dv, itemsize, budget, block_q)
    qf = q.reshape(BH, Lq, dk)
    kf = k.reshape(BH, Lk, dk)
    vf = v.reshape(BH, Lk, dv)

    out, score = pl.pallas_call(
        functools.partial(_attn_with_score_kernel, scale=scale),
        out_shape=(
            jax.ShapeDtypeStruct((BH, Lq, dv), q.dtype),
            jax.ShapeDtypeStruct((BH, Lq, Lk), q.dtype),
        ),
        grid_spec=pltpu.PrefetchScalarGridSpec(
            num_scalar_prefetch=0,
            grid=(BH, Lq // tq),
            in_specs=[
                pl.BlockSpec((1, tq, dk), lambda b, qi: (b, qi, 0)),
                pl.BlockSpec((1, Lk, dk), lambda b, qi: (b, 0, 0)),
                pl.BlockSpec((1, Lk, dv), lambda b, qi: (b, 0, 0)),
            ],
            out_specs=(
                pl.BlockSpec((1, tq, dv), lambda b, qi: (b, qi, 0)),
                pl.BlockSpec((1, tq, Lk), lambda b, qi: (b, qi, 0)),
            ),
        ),
        compiler_params=pltpu.CompilerParams(
            dimension_semantics=("parallel", "parallel"),
            vmem_limit_bytes=vmem_limit),
        cost_estimate=pl.CostEstimate(
            flops=flops, transcendentals=transcendentals,
            bytes_accessed=io_bytes + BH * Lq * Lk * itemsize),
    )(qf, kf, vf)

    out = out.reshape(B, H, Lq, dv)
    score = score.reshape(B, H, Lq, Lk)
    if squeeze_head:
        out, score = out[:, 0], score[:, 0]
    return out, score


# ----------------------------------------------------------------------------
# Reference + test
# ----------------------------------------------------------------------------
def _reference(k, q, v, scale=None):
    scale = scale if scale is not None else 1.0 / math.sqrt(k.shape[-1])
    s = scale * jnp.einsum("...qd,...kd->...qk", q, k)
    p = jax.nn.softmax(s, axis=-1)
    return jnp.einsum("...qk,...kd->...qd", p, v), p


if __name__ == "__main__":
    key = jax.random.PRNGKey(0)
    kq, kk, kv_ = jax.random.split(key, 3)

    # Multi-head path: B=2, n_head=2, Ls=8, dk=dv=32
    B, H, Ls, D = 2, 2, 8, 32
    q = jax.random.normal(kq, (B, H, Ls, D), dtype=jnp.float32)
    k = jax.random.normal(kk, (B, H, Ls, D), dtype=jnp.float32)
    v = jax.random.normal(kv_, (B, H, Ls, D), dtype=jnp.float32)

    out = jax.block_until_ready(attention(k, q, v))
    ref, _ = _reference(k, q, v)
    assert out.shape == (B, H, Ls, D)
    assert jnp.allclose(out, ref, atol=2e-3, rtol=2e-3), "flash path mismatch"

    # Forced multi-tile grid: exercises the online softmax across several kv steps.
    B2, H2, Ls2, D2 = 1, 4, 32, 32
    k2q, k2k, k2v = jax.random.split(jax.random.PRNGKey(1), 3)
    q2 = jax.random.normal(k2q, (B2, H2, Ls2, D2), dtype=jnp.float32)
    k2 = jax.random.normal(k2k, (B2, H2, Ls2, D2), dtype=jnp.float32)
    v2 = jax.random.normal(k2v, (B2, H2, Ls2, D2), dtype=jnp.float32)
    out2 = jax.block_until_ready(attention(k2, q2, v2, block_q=8, block_k=8))
    ref2, _ = _reference(k2, q2, v2)
    assert jnp.allclose(out2, ref2, atol=2e-3, rtol=2e-3), "multi-tile flash mismatch"

    # 3-D (B, Ls, D) path with return_score=True (exact softmax divide in-kernel).
    out3, score3 = attention(k[:, 0], q[:, 0], v[:, 0], return_score=True)
    out3 = jax.block_until_ready(out3)
    ref3, refp3 = _reference(k[:, 0], q[:, 0], v[:, 0])
    assert out3.shape == (B, Ls, D) and score3.shape == (B, Ls, Ls)
    assert jnp.allclose(out3, ref3, atol=2e-3, rtol=2e-3), "3-D path mismatch"
    assert jnp.allclose(score3, refp3, atol=2e-3, rtol=2e-3), "score mismatch"
    assert jnp.allclose(jnp.sum(score3, axis=-1), 1.0, atol=1e-3), "score not normalized"

    print("KERNEL_OK")
</pallas_src>

<mosaic_0001>
module attributes {stable_mosaic.version = 11 : i64} {
  func.func @_flash_attn_kernel(%arg0: i32, %arg1: i32, %arg2: i32, %arg3: memref<1x2x8x32xf32, #tpu.memory_space<vmem>>, %arg4: memref<1x2x8x32xf32, #tpu.memory_space<vmem>>, %arg5: memref<1x2x8x32xf32, #tpu.memory_space<vmem>>, %arg6: memref<1x8x64xf32, #tpu.memory_space<vmem>>, %arg7: memref<2x8x32xf32, #tpu.memory_space<vmem>>, %arg8: memref<2x8x1xf32, #tpu.memory_space<vmem>>, %arg9: memref<2x8x1xf32, #tpu.memory_space<vmem>>, %arg10: memref<8x64xf32, #tpu.memory_space<vmem>>) attributes {dimension_semantics = [#tpu.dimension_semantics<parallel>, #tpu.dimension_semantics<parallel>, #tpu.dimension_semantics<arbitrary>], iteration_bounds = array<i64: 2, 1, 1>, scalar_prefetch = 0 : i64, scratch_operands = 4 : i64, tpu.core_type = #tpu.core_type<tc>, window_params = [{transform_indices = @transform_0, window_bounds = array<i64: 1, 2, 8, 32>}, {transform_indices = @transform_1, window_bounds = array<i64: 1, 2, 8, 32>}, {transform_indices = @transform_2, window_bounds = array<i64: 1, 2, 8, 32>}, {transform_indices = @transform_3, window_bounds = array<i64: 1, 8, 64>}]} {
    %c0_i32 = arith.constant 0 : i32
    %0 = arith.cmpi eq, %arg2, %c0_i32 : i32
    %1 = arith.extui %0 : i1 to i32
    %c0_i32_0 = arith.constant 0 : i32
    %2 = arith.cmpi ne, %1, %c0_i32_0 : i32
    scf.if %2 {
      %c0_36 = arith.constant 0 : index
      %c0_37 = arith.constant 0 : index
      %c0_38 = arith.constant 0 : index
      %c0_39 = arith.constant 0 : index
      %52 = vector.load %arg3[%c0_36, %c0_37, %c0_38, %c0_39] : memref<1x2x8x32xf32, #tpu.memory_space<vmem>>, vector<1x2x8x32xf32>
      %53 = vector.shape_cast %52 : vector<1x2x8x32xf32> to vector<2x8x32xf32>
      %cst_40 = arith.constant 0.176776692 : f32
      %54 = vector.broadcast %cst_40 : f32 to vector<2x8x32xf32>
      %55 = arith.mulf %53, %54 : vector<2x8x32xf32>
      %c0_41 = arith.constant 0 : index
      %c0_42 = arith.constant 0 : index
      %c0_43 = arith.constant 0 : index
      %56 = vector.load %arg7[%c0_41, %c0_42, %c0_43] : memref<2x8x32xf32, #tpu.memory_space<vmem>>, vector<2x8x32xf32>
      tpu.vector_store %arg7[%c0_41, %c0_42, %c0_43], %55 {strides = array<i32>} : memref<2x8x32xf32, #tpu.memory_space<vmem>>, vector<2x8x32xf32>,
      %cst_44 = arith.constant 0xFF800000 : f32
      %57 = vector.broadcast %cst_44 : f32 to vector<2x8x1xf32>
      %c0_45 = arith.constant 0 : index
      %c0_46 = arith.constant 0 : index
      %c0_47 = arith.constant 0 : index
      %58 = vector.load %arg8[%c0_45, %c0_46, %c0_47] : memref<2x8x1xf32, #tpu.memory_space<vmem>>, vector<2x8x1xf32>
      tpu.vector_store %arg8[%c0_45, %c0_46, %c0_47], %57 {strides = array<i32>} : memref<2x8x1xf32, #tpu.memory_space<vmem>>, vector<2x8x1xf32>,
      %cst_48 = arith.constant 0.000000e+00 : f32
      %59 = vector.broadcast %cst_48 : f32 to vector<2x8x1xf32>
      %c0_49 = arith.constant 0 : index
      %c0_50 = arith.constant 0 : index
      %c0_51 = arith.constant 0 : index
      %60 = vector.load %arg9[%c0_49, %c0_50, %c0_51] : memref<2x8x1xf32, #tpu.memory_space<vmem>>, vector<2x8x1xf32>
      tpu.vector_store %arg9[%c0_49, %c0_50, %c0_51], %59 {strides = array<i32>} : memref<2x8x1xf32, #tpu.memory_space<vmem>>, vector<2x8x1xf32>,
      %cst_52 = arith.constant 0.000000e+00 : f32
      %61 = vector.broadcast %cst_52 : f32 to vector<8x64xf32>
      %c0_53 = arith.constant 0 : index
      %c0_54 = arith.constant 0 : index
      %62 = vector.load %arg10[%c0_53, %c0_54] : memref<8x64xf32, #tpu.memory_space<vmem>>, vector<8x64xf32>
      tpu.vector_store %arg10[%c0_53, %c0_54], %61 {strides = array<i32>} : memref<8x64xf32, #tpu.memory_space<vmem>>, vector<8x64xf32>,
    } else {
    }
    %c0 = arith.constant 0 : index
    %c0_1 = arith.constant 0 : index
    %c0_2 = arith.constant 0 : index
    %3 = vector.load %arg7[%c0, %c0_1, %c0_2] : memref<2x8x32xf32, #tpu.memory_space<vmem>>, vector<2x8x32xf32>
    %c0_3 = arith.constant 0 : index
    %c0_4 = arith.constant 0 : index
    %c0_5 = arith.constant 0 : index
    %c0_6 = arith.constant 0 : index
    %4 = vector.load %arg4[%c0_3, %c0_4, %c0_5, %c0_6] : memref<1x2x8x32xf32, #tpu.memory_space<vmem>>, vector<1x2x8x32xf32>
    %5 = vector.shape_cast %4 : vector<1x2x8x32xf32> to vector<2x8x32xf32>
    %c0_7 = arith.constant 0 : index
    %c0_8 = arith.constant 0 : index
    %c0_9 = arith.constant 0 : index
    %c0_10 = arith.constant 0 : index
    %6 = vector.load %arg5[%c0_7, %c0_8, %c0_9, %c0_10] : memref<1x2x8x32xf32, #tpu.memory_space<vmem>>, vector<1x2x8x32xf32>
    %7 = vector.shape_cast %6 : vector<1x2x8x32xf32> to vector<2x8x32xf32>
    "tpu.trace_start"() <{level = 10 : i32, message = "hqd,hkd->hqk"}> : () -> ()
    %cst = arith.constant dense<0.000000e+00> : vector<2x8x8xf32>
    %8 = tpu.matmul %3, %5, %cst {dimension_numbers = #tpu.dot_dimension_numbers<[2], [2], [1], [1], [0, 0, 0, 1, 1, 1], [0], [0]>} : vector<2x8x32xf32>, vector<2x8x32xf32>, vector<2x8x8xf32> -> vector<2x8x8xf32>
    "tpu.trace_stop"() : () -> ()
    %c0_11 = arith.constant 0 : index
    %c0_12 = arith.constant 0 : index
    %c0_13 = arith.constant 0 : index
    %9 = vector.load %arg8[%c0_11, %c0_12, %c0_13] : memref<2x8x1xf32, #tpu.memory_space<vmem>>, vector<2x8x1xf32>
    %cst_14 = arith.constant dense<0xFF800000> : vector<2x8xf32>
    %10 = vector.multi_reduction <maximumf>, %8, %cst_14 [2] : vector<2x8x8xf32> to vector<2x8xf32>
    %11 = vector.shape_cast %10 : vector<2x8xf32> to vector<2x8x1xf32>
    %12 = arith.maximumf %9, %11 : vector<2x8x1xf32>
    %13 = arith.subf %9, %12 : vector<2x8x1xf32>
    %14 = math.exp %13 : vector<2x8x1xf32>
    %15 = vector.broadcast %12 : vector<2x8x1xf32> to vector<2x8x8xf32>
    %16 = arith.subf %8, %15 : vector<2x8x8xf32>
    %17 = math.exp %16 : vector<2x8x8xf32>
    %c0_15 = arith.constant 0 : index
    %c0_16 = arith.constant 0 : index
    %c0_17 = arith.constant 0 : index
    %18 = vector.load %arg9[%c0_15, %c0_16, %c0_17] : memref<2x8x1xf32, #tpu.memory_space<vmem>>, vector<2x8x1xf32>
    %19 = arith.mulf %14, %18 : vector<2x8x1xf32>
    %cst_18 = arith.constant dense<0.000000e+00> : vector<2x8xf32>
    %20 = vector.multi_reduction <add>, %17, %cst_18 [2] : vector<2x8x8xf32> to vector<2x8xf32>
    %21 = vector.shape_cast %20 : vector<2x8xf32> to vector<2x8x1xf32>
    %22 = arith.addf %19, %21 : vector<2x8x1xf32>
    %c0_19 = arith.constant 0 : index
    %c0_20 = arith.constant 0 : index
    %c0_21 = arith.constant 0 : index
    %23 = vector.load %arg9[%c0_19, %c0_20, %c0_21] : memref<2x8x1xf32, #tpu.memory_space<vmem>>, vector<2x8x1xf32>
    tpu.vector_store %arg9[%c0_19, %c0_20, %c0_21], %22 {strides = array<i32>} : memref<2x8x1xf32, #tpu.memory_space<vmem>>, vector<2x8x1xf32>,
    %c0_22 = arith.constant 0 : index
    %c0_23 = arith.constant 0 : index
    %c0_24 = arith.constant 0 : index
    %24 = vector.load %arg8[%c0_22, %c0_23, %c0_24] : memref<2x8x1xf32, #tpu.memory_space<vmem>>, vector<2x8x1xf32>
    tpu.vector_store %arg8[%c0_22, %c0_23, %c0_24], %12 {strides = array<i32>} : memref<2x8x1xf32, #tpu.memory_space<vmem>>, vector<2x8x1xf32>,
    %25 = vector.extract_strided_slice %14 {offsets = [0, 0, 0], sizes = [1, 8, 1], strides = [1, 1, 1]} : vector<2x8x1xf32> to vector<1x8x1xf32>
    %26 = vector.shape_cast %25 : vector<1x8x1xf32> to vector<8x1xf32>
    %c0_25 = arith.constant 0 : index
    %c0_26 = arith.constant 0 : index
    %27 = vector.load %arg10[%c0_25, %c0_26] : memref<8x64xf32, #tpu.memory_space<vmem>>, vector<8x32xf32>
    %28 = vector.broadcast %26 : vector<8x1xf32> to vector<8x32xf32>
    %29 = arith.mulf %28, %27 : vector<8x32xf32>
    %30 = vector.extract_strided_slice %17 {offsets = [0, 0, 0], sizes = [1, 8, 8], strides = [1, 1, 1]} : vector<2x8x8xf32> to vector<1x8x8xf32>
    %31 = vector.shape_cast %30 : vector<1x8x8xf32> to vector<8x8xf32>
    %32 = vector.extract_strided_slice %7 {offsets = [0, 0, 0], sizes = [1, 8, 32], strides = [1, 1, 1]} : vector<2x8x32xf32> to vector<1x8x32xf32>
    %33 = vector.shape_cast %32 : vector<1x8x32xf32> to vector<8x32xf32>
    %cst_27 = arith.constant dense<0.000000e+00> : vector<8x32xf32>
    %34 = tpu.matmul %31, %33, %cst_27 {dimension_numbers = #tpu.dot_dimension_numbers<[1], [0], [0], [1], [0, 0, 1, 1], [], []>} : vector<8x8xf32>, vector<8x32xf32>, vector<8x32xf32> -> vector<8x32xf32>
    %35 = arith.addf %29, %34 : vector<8x32xf32>
    %c0_28 = arith.constant 0 : index
    %c0_29 = arith.constant 0 : index
    %36 = vector.load %arg10[%c0_28, %c0_29] : memref<8x64xf32, #tpu.memory_space<vmem>>, vector<8x32xf32>
    tpu.vector_store %arg10[%c0_28, %c0_29], %35 {strides = array<i32>} : memref<8x64xf32, #tpu.memory_space<vmem>>, vector<8x32xf32>,
    %37 = vector.extract_strided_slice %14 {offsets = [1, 0, 0], sizes = [1, 8, 1], strides = [1, 1, 1]} : vector<2x8x1xf32> to vector<1x8x1xf32>
    %38 = vector.shape_cast %37 : vector<1x8x1xf32> to vector<8x1xf32>
    %c0_30 = arith.constant 0 : index
    %c32 = arith.constant 32 : index
    %39 = vector.load %arg10[%c0_30, %c32] : memref<8x64xf32, #tpu.memory_space<vmem>>, vector<8x32xf32>
    %40 = vector.broadcast %38 : vector<8x1xf32> to vector<8x32xf32>
    %41 = arith.mulf %40, %39 : vector<8x32xf32>
    %42 = vector.extract_strided_slice %17 {offsets = [1, 0, 0], sizes = [1, 8, 8], strides = [1, 1, 1]} : vector<2x8x8xf32> to vector<1x8x8xf32>
    %43 = vector.shape_cast %42 : vector<1x8x8xf32> to vector<8x8xf32>
    %44 = vector.extract_strided_slice %7 {offsets = [1, 0, 0], sizes = [1, 8, 32], strides = [1, 1, 1]} : vector<2x8x32xf32> to vector<1x8x32xf32>
    %45 = vector.shape_cast %44 : vector<1x8x32xf32> to vector<8x32xf32>
    %cst_31 = arith.constant dense<0.000000e+00> : vector<8x32xf32>
    %46 = tpu.matmul %43, %45, %cst_31 {dimension_numbers = #tpu.dot_dimension_numbers<[1], [0], [0], [1], [0, 0, 1, 1], [], []>} : vector<8x8xf32>, vector<8x32xf32>, vector<8x32xf32> -> vector<8x32xf32>
    %47 = arith.addf %41, %46 : vector<8x32xf32>
    %c0_32 = arith.constant 0 : index
    %c32_33 = arith.constant 32 : index
    %48 = vector.load %arg10[%c0_32, %c32_33] : memref<8x64xf32, #tpu.memory_space<vmem>>, vector<8x32xf32>
    tpu.vector_store %arg10[%c0_32, %c32_33], %47 {strides = array<i32>} : memref<8x64xf32, #tpu.memory_space<vmem>>, vector<8x32xf32>,
    %c0_i32_34 = arith.constant 0 : i32
    %49 = arith.cmpi eq, %arg2, %c0_i32_34 : i32
    %50 = arith.extui %49 : i1 to i32
    %c0_i32_35 = arith.constant 0 : i32
    %51 = arith.cmpi ne, %50, %c0_i32_35 : i32
    scf.if %51 {
      %c0_36 = arith.constant 0 : index
      %c0_37 = arith.constant 0 : index
      %c0_38 = arith.constant 0 : index
      %52 = vector.load %arg9[%c0_36, %c0_37, %c0_38] : memref<2x8x1xf32, #tpu.memory_space<vmem>>, vector<2x8x1xf32>
      %cst_39 = arith.constant 1.000000e+00 : f32
      %53 = vector.broadcast %cst_39 : f32 to vector<2x8x1xf32>
      %54 = arith.divf %53, %52 : vector<2x8x1xf32>
      %c0_40 = arith.constant 0 : index
      %c0_41 = arith.constant 0 : index
      %55 = vector.load %arg10[%c0_40, %c0_41] : memref<8x64xf32, #tpu.memory_space<vmem>>, vector<8x32xf32>
      %56 = vector.extract_strided_slice %54 {offsets = [0, 0, 0], sizes = [1, 8, 1], strides = [1, 1, 1]} : vector<2x8x1xf32> to vector<1x8x1xf32>
      %57 = vector.shape_cast %56 : vector<1x8x1xf32> to vector<8x1xf32>
      %58 = vector.broadcast %57 : vector<8x1xf32> to vector<8x32xf32>
      %59 = arith.mulf %55, %58 : vector<8x32xf32>
      %c0_42 = arith.constant 0 : index
      %c0_43 = arith.constant 0 : index
      %60 = vector.load %arg10[%c0_42, %c0_43] : memref<8x64xf32, #tpu.memory_space<vmem>>, vector<8x32xf32>
      tpu.vector_store %arg10[%c0_42, %c0_43], %59 {strides = array<i32>} : memref<8x64xf32, #tpu.memory_space<vmem>>, vector<8x32xf32>,
      %c0_44 = arith.constant 0 : index
      %c32_45 = arith.constant 32 : index
      %61 = vector.load %arg10[%c0_44, %c32_45] : memref<8x64xf32, #tpu.memory_space<vmem>>, vector<8x32xf32>
      %62 = vector.extract_strided_slice %54 {offsets = [1, 0, 0], sizes = [1, 8, 1], strides = [1, 1, 1]} : vector<2x8x1xf32> to vector<1x8x1xf32>
      %63 = vector.shape_cast %62 : vector<1x8x1xf32> to vector<8x1xf32>
      %64 = vector.broadcast %63 : vector<8x1xf32> to vector<8x32xf32>
      %65 = arith.mulf %61, %64 : vector<8x32xf32>
      %c0_46 = arith.constant 0 : index
      %c32_47 = arith.constant 32 : index
      %66 = vector.load %arg10[%c0_46, %c32_47] : memref<8x64xf32, #tpu.memory_space<vmem>>, vector<8x32xf32>
      tpu.vector_store %arg10[%c0_46, %c32_47], %65 {strides = array<i32>} : memref<8x64xf32, #tpu.memory_space<vmem>>, vector<8x32xf32>,
      %c0_48 = arith.constant 0 : index
      %c0_49 = arith.constant 0 : index
      %67 = vector.load %arg10[%c0_48, %c0_49] : memref<8x64xf32, #tpu.memory_space<vmem>>, vector<8x64xf32>
      %c0_50 = arith.constant 0 : index
      %c0_51 = arith.constant 0 : index
      %c0_52 = arith.constant 0 : index
      %68 = vector.load %arg6[%c0_50, %c0_51, %c0_52] : memref<1x8x64xf32, #tpu.memory_space<vmem>>, vector<1x8x64xf32>
      %69 = vector.shape_cast %68 : vector<1x8x64xf32> to vector<8x64xf32>
      %70 = vector.shape_cast %67 : vector<8x64xf32> to vector<1x8x64xf32>
      tpu.vector_store %arg6[%c0_50, %c0_51, %c0_52], %70 {strides = array<i32>} : memref<1x8x64xf32, #tpu.memory_space<vmem>>, vector<1x8x64xf32>,
    } else {
    }
    return
  }
  func.func @transform_0(%arg0: i32, %arg1: i32, %arg2: i32) -> (i32, i32, i32, i32) {
    %c0_i32 = arith.constant 0 : i32
    %c0_i32_0 = arith.constant 0 : i32
    %c0_i32_1 = arith.constant 0 : i32
    return %arg0, %c0_i32, %arg1, %c0_i32_0 : i32, i32, i32, i32
  }
  func.func @transform_1(%arg0: i32, %arg1: i32, %arg2: i32) -> (i32, i32, i32, i32) {
    %c0_i32 = arith.constant 0 : i32
    %c0_i32_0 = arith.constant 0 : i32
    %c0_i32_1 = arith.constant 0 : i32
    return %arg0, %c0_i32, %arg2, %c0_i32_0 : i32, i32, i32, i32
  }
  func.func @transform_2(%arg0: i32, %arg1: i32, %arg2: i32) -> (i32, i32, i32, i32) {
    %c0_i32 = arith.constant 0 : i32
    %c0_i32_0 = arith.constant 0 : i32
    %c0_i32_1 = arith.constant 0 : i32
    return %arg0, %c0_i32, %arg2, %c0_i32_0 : i32, i32, i32, i32
  }
  func.func @transform_3(%arg0: i32, %arg1: i32, %arg2: i32) -> (i32, i32, i32) {
    %c0_i32 = arith.constant 0 : i32
    %c0_i32_0 = arith.constant 0 : i32
    return %arg0, %arg1, %c0_i32 : i32, i32, i32
  }
}

</mosaic_0001>

<bundles_post_ra>
// kernel: tpu_custom_call.1
= control target key start
LH: loop header
LB: loop body
LE: loop exit
PB: predicated region body
PF: predicated region fallthrough
CT: control target
= control target key end

     0   :  { %s1214_s0 = inlined_call_operand.hbm [shape: f32[2,2,8,32], index: 0, kind: input, shape index: {}]   ;;  %s1215_s1 = inlined_call_operand.hbm [shape: f32[2,2,8,32], index: 1, kind: input, shape index: {}]   ;;  %s1216_s2 = inlined_call_operand.hbm [shape: f32[2,2,8,32], index: 2, kind: input, shape index: {}]   ;;  %s1217_s3 = inlined_call_operand.hbm [shape: f32[2,8,64], index: 3, kind: output, shape index: {}]  }
   0x1   :  { %1223 = sst [smem:[#allocation21_spill]] %s1215_s1 }
   0x2   :  { %8 = vsyncpa [#allocation7], 0 }
   0x3   :  { %10 = vsyncpa [#allocation7 + $0x1], 0 }
   0x4   :  { %11 = vsyncpa [#allocation10], 0 }
   0x5   :  { %13 = vsyncpa [#allocation10 + $0x1], 0 }
   0x6   :  { %14 = vsyncpa [#allocation8], 0 }
   0x7   :  { %16 = vsyncpa [#allocation8 + $0x1], 0  ;;  %s1027_s12 = smov 0   ;;  %s1029_s13 = smov 0  }
   0x8   :  { %s1031_s14 = smov 0   ;;  %s1033_s15 = smov 0  }
   0x9   :  { %s1035_s16 = smov 0   ;;  %s1037_s17 = smov 0  }
   0xa LB: > { %1224 = sst [smem:[#allocation16_spill]] %s987_s14  ;;  %s1058_s18 = sadd.s32 4294967295, %s999_s17   ;;  %s999_s17 = sphi %s1037_s17, %s22_s17   ;;  %s995_s16 = sphi %s1035_s16, %s1240_s16   ;;  %s991_s15 = sphi %s1033_s15, %s1239_s15   ;;  %s987_s14 = sphi %s1031_s14, %s1243_s14   ;;  %s983_s13 = sphi %s1029_s13, %s1242_s13   ;;  %s979_s12 = sphi %s1027_s12, %s1241_s12  }
   0xb   : > { %1225 = sst [smem:[#allocation17_spill]] %s995_s16  ;;  %s701_s19 = sadd.s32 4294967294, %s999_s17  }
   0xc   : > { %1226 = sst [smem:[#allocation18_spill]] %s999_s17  ;;  %s41_s20 = sadd.s32 1, %s995_s16 }
   0xd   : > { %s50_s21 = sadd.s32 1, %s987_s14  ;;  %p43_p0 = scmp.ge.s32.totalorder %s41_s20, 2 }
   0xe   : > { %p57_p1 = scmp.ne.s32.totalorder %s987_s14, %s983_s13  ;;  %p58_p2 = scmp.eq.s32.totalorder %s999_s17, 0 }
   0xf   : > { %p63_p3 = scmp.ne.s32.totalorder %s983_s13, %s979_s12  ;;  %s1245_s20 = smov (%p43_p0, %s41_s20), 0 }
  0x10   : > { %1227 = sst [smem:[#allocation19_spill]] %s1245_s20  ;;  %p1070_p4 = por %p58_p2, %p57_p1 }
  0x11   : > { %p64_p5 = scmp.eq.s32.totalorder %s1058_s18, 0  ;;  %s45_s23 = ssub.s32 %s995_s16, %s1245_s20 }
  0x12   : > { %p145_p6 = scmp.eq.s32.totalorder %s1058_s18, 1  ;;  %p48_p7 = scmp.eq.s32.totalorder %s45_s23, 0 }
  0x13   : > { %p1078_p8 = por %p64_p5, %p63_p3  ;;  %p151_p10 = scmp.eq.s32.totalorder %s701_s19, 1 }
  0x14   : > { %p1082_p9 = por %p145_p6, %p57_p1  ;;  %p703_p12 = scmp.ge.s32.totalorder %s999_s17, 2 }
  0x15   : > { %s1087_s26 = scalar_select %p48_p7, %s987_s14, %s50_s21  }
  0x16   : > { %p1089_p11 = por %p151_p10, %p63_p3  ;;  %p753_p13 = scmp.lt.s32.totalorder %s999_s17, 2 }
  0x17   : > { %1231 = sst [smem:[#allocation20_spill]] %s1087_s26  ;;  %s171_s28 = sand.u32 1, %s987_s14  }
  0x18   : > { %s1096_s29 = sshll.u32 %s171_s28, 4  ;;  %s728_s30 = sshll.u32 %s995_s16, 4 }
  0x19   : > { %p1101_p0 = pnand %p753_p13, %p1070_p4  ;;  %s194_s5 = sand.u32 1, %s999_s17  }
  0x1a   : > { %s1234_s1 = sld [smem:[#allocation21_spill]]  ;;  %s198_s10 = scalar_lea.vmem [#allocation9], %s1096_s29 }
  0x1b   : > { %s207_s11 = sshll.u32 %s198_s10, 4  ;;  %s195_s19 = scalar_lea.sflag [#allocation10], %s194_s5  ;;  %s208_s11 = int_to_ptr.vmem [resolvable:$true] %s207_s11 }
  0x1c   : > { %s1001_s21 = smov 128   ;;  %s1002_s22 = smov 8  }
  0x1d   : > { %p713_p1 = scmp.ge.s32.totalorder %s999_s17, 1  ;;  %p238_p2 = scmp.lt.s32.totalorder %s999_s17, 3 }
  0x1e   : > { %s172_s5 = scalar_lea.sflag [#allocation7], %s171_s28  ;;  %s227_s16 = scalar_lea.hbm %s1216_s2, %s728_s30 }
  0x1f   : > { %p1114_p3 = pnand %p713_p1, %p238_p2  ;;  %s228_s26 = sshll.u32 %s227_s16, 4  ;;  %s229_s26 = int_to_ptr.hbm [resolvable:$true] %s228_s26 }
  0x20   : > { %s204_s8 = scalar_lea.hbm %s1234_s1, %s728_s30  ;;  %s175_s1 = scalar_lea.vmem [#allocation6], %s1096_s29 }
  0x21   : > { %s205_s9 = sshll.u32 %s204_s8, 4  ;;  %s181_s8 = scalar_lea.hbm %s1214_s0, %s728_s30  ;;  %s206_s9 = int_to_ptr.hbm [resolvable:$true] %s205_s9 }
  0x22   : > { %745 = dma.hbm_to_vmem [thread:$0]  (!%p1101_p0), %s206_s9, 256, %s208_s11, %s195_s19, %s1001_s21, %s1001_s21, %s1002_s22  }
  0x23   : > { %s182_s10 = sshll.u32 %s181_s8, 4  ;;  %s184_s20 = sshll.u32 %s175_s1, 4  ;;  %s183_s10 = int_to_ptr.hbm [resolvable:$true] %s182_s10  ;;  %s185_s20 = int_to_ptr.vmem [resolvable:$true] %s184_s20 }
  0x24   : > { %742 = dma.hbm_to_vmem [thread:$0]  (!%p1101_p0), %s183_s10, 256, %s185_s20, %s172_s5, %s1001_s21, %s1001_s21, %s1002_s22  }
  0x25   : > { %s221_s14 = scalar_lea.vmem [#allocation11], %s1096_s29  ;;  %242 = sbr.rel (%p1114_p3) target bundleno = 719 (0x2cf), region = 32 }
  0x26   : > { %s230_s17 = sshll.u32 %s221_s14, 4  ;;  %s1133_s1 = sand.u32 (!%p1114_p3), 1, %s983_s13   ;;  %s231_s17 = int_to_ptr.vmem [resolvable:$true] %s230_s17 }
  0x27   : > { %748 = dma.hbm_to_vmem [thread:$0]  (!%p1101_p0), %s229_s26, 256, %s231_s17, %s195_s19, %s1001_s21, %s1001_s21, %s1002_s22  }
  0x28   : > { %s1136_s20 = sshll.u32 (!%p1114_p3), %s1133_s1, 4  ;;  %s245_s28 = scalar_lea.sflag (!%p1114_p3), [#allocation7], %s1133_s1 }
  0x29   : > { %s248_s16 = scalar_lea.vmem (!%p1114_p3), [#allocation6], %s1136_s20 }
  0x2a   : > { %966 = dma.done.wait (%p1078_p8), %s245_s28, 256  }
  0x2b   : > { %968 = vsyncadd (%p1078_p8), %s245_s28, 4294967040  ;;  %s254_s14 = sand.u32 1, %s1058_s18   ;;  %s258_s26 = scalar_lea.vmem [#allocation9], %s1136_s20 }
  0x2c   : > { %s255_s17 = scalar_lea.sflag [#allocation10], %s254_s14 }
  0x2d   : > { %970 = dma.done.wait (%p1078_p8), %s255_s17, 512  }
  0x2e   : > { %972 = vsyncadd (%p1078_p8), %s255_s17, 4294966784  ;;  %v306_v0 = vld [vmem:[%s248_s16] sm:$0xff]  ;;  %v307_v1 = vld [vmem:[%s248_s16 + $0x8] sm:$0xff]  ;;  %vm310_vm0 = vcmask 261120   ;;  %vm313_vm1 = vcmask 7168   ;;  %v1003_v8 = vmov -inf  }
  0x2f   : > { %v323_v2 = vld [vmem:[%s258_s26 + $0x8] sm:$0xff]  ;;  %v308_v3 = vmul.f32 0.17677669, %v306_v0  ;;  %v309_v4 = vmul.f32 0.17677669, %v307_v1  ;;  %v322_v5 = vld [vmem:[%s258_s26] sm:$0xff] }
  0x30   : > { %720 = vmatpush.xpose.msk.msra.mxu1 %vm310_vm0, %v323_v2  ;;  %718 = vmatpush.xpose.msk.msra.mxu0 %vm310_vm0, %v322_v5  ;;  %315 = vst.msk [vmem:[#allocation3 + $0x8] sm:$0xff] %vm313_vm1, %v1003_v8  ;;  %vm381_vm2 = vcmask 64512   ;;  %v1004_v13 = vmov 0   ;;  %v1005_v14 = vmov 0.0   ;;  %s268_s18 = scalar_lea.vmem [#allocation11], %s1136_s20  ;;  %vm318_vm3 = vcmask 523264  }
  0x31   : > { %311 = vst.msk [vmem:[#allocation2] sm:$0xff] %vm310_vm0, %v308_v3  ;;  %809 = vset.pattern.permute.xlu1 %v1004_v13  ;;  %810 = vset.pattern.permute.xlu0 %v1004_v13  ;;  %v325_v27 = vld [vmem:[%s268_s18 + $0x8] sm:$0xff]  ;;  %v324_v28 = vld [vmem:[%s268_s18] sm:$0xff]  ;;  %s1006_s24 = smov 32   ;;  %vm496_vm12 = vcmask 523520   ;;  %s717_s29 = sshll.u32 %s1133_s1, 3 }
  0x32   : > { %312 = vst.msk [vmem:[#allocation2 + $0x8] sm:$0xff] %vm310_vm0, %v309_v4  ;;  %486 = vmatpush.msra.mxu3 %v325_v27  ;;  %454 = vmatpush.msra.mxu2 %v324_v28  ;;  %s725_s30 = sshll.u32 %s991_s15, 3  ;;  %s301_s22 = scalar_lea.vmem [#allocation12], %s717_s29 }
  0x33   : > { %314 = vst.msk [vmem:[#allocation3] sm:$0xff] %vm313_vm1, %v1003_v8  ;;  %s564_s21 = scalar_lea.hbm %s1217_s3, %s725_s30  ;;  %s566_s23 = sshll.u32 %s301_s22, 4  ;;  %s567_s23 = int_to_ptr.vmem [resolvable:$true] %s566_s23 }
  0x34   : > { %316 = vst.msk [vmem:[#allocation4] sm:$0xff] %vm313_vm1, %v1005_v14  ;;  %s568_s6 = sshll.u32 %s564_s21, 4  ;;  %s553_s7 = scalar_lea.sflag [#allocation8], %s1133_s1  ;;  %s569_s6 = int_to_ptr.hbm [resolvable:$true] %s568_s6 }
  0x35   : > { %317 = vst.msk [vmem:[#allocation4 + $0x8] sm:$0xff] %vm313_vm1, %v1005_v14  ;;  %s927_s8 = sshra.s32 %s569_s6, 4  ;;  %s933_s9 = scalar_lea.hbm %s1217_s3, 16  ;;  %s928_s8 = int_to_ptr.hbm [resolvable:$true] %s927_s8 }
  0x36   : > { %319 = vst.msk [vmem:[#allocation5] sm:$0xff] %vm318_vm3, %v1005_v14  ;;  %s929_s10 = scalar_lea.hbm %s928_s8, 8  ;;  %p934_p7 = scmp.lt.s32.totalorder %s928_s8, %s1217_s3 }
  0x37   : > { %v380_v15 = vld [vmem:[#allocation3 + $0x8] sm:$0xff]  ;;  %p930_p4 = scmp.ne.s32.totalorder %s928_s8, %s929_s10  ;;  %p935_p8 = scmp.lt.s32.totalorder %s933_s9, %s929_s10 }
  0x38   : > { %v320_v6 = vld [vmem:[#allocation2] sm:$0xff] }
  0x39   : > { %v321_v7 = vld [vmem:[#allocation2 + $0x8] sm:$0xff]  ;;  %719 = vmatmul.msk.f32.vlgmr.msra.gmra.mxu0 %vm310_vm0, %v320_v6  ;;  %p931_p5 = pnand %p930_p4, %p1082_p9  ;;  %p936_p10 = por %p935_p8, %p934_p7 }
  0x3a   : > { %721 = vmatmul.msk.f32.vlgmr.msra.gmra.mxu1 %vm310_vm0, %v321_v7  ;;  %v379_v19 = vld [vmem:[#allocation3] sm:$0xff] }
  0x3b   : > { %v412_v39 = vld [vmem:[#allocation4] sm:$0xff]  ;;  %p932_p6 = pneg %p931_p5 }
  0x3c   : > { %v413_v43 = vld [vmem:[#allocation4 + $0x8] sm:$0xff] }
  0x3d   : > { %v429_v49 = vld [vmem:[#allocation5] sm:$0xff]  ;;  %p937_p13 = pnand %p936_p10, %p932_p6 }
  0xb6   : > { %v350_v11 = vpop.f32.mrf.mxu0 }
  0xb7   : > { %v376_v9 = vpop.f32.mrf.mxu1  ;;  %v382_v12 = vsel %vm381_vm2, %v350_v11, -inf }
  0xb8   : > { %v385_v10 = vsel %vm381_vm2, %v376_v9, -inf }
  0xb9   : > { %386 = vmax.xlane.f32.xlu0 %v385_v10 }
  0xc1   : > { %383 = vmax.xlane.f32.xlu0 %v382_v12 }
 0x12c   : > { %v387_v16 = vpop.xlane.xlu0 %386 }
 0x12d   : > { %v389_v17 = vmax.f32 %v380_v15, %v387_v16 }
 0x12f   : > { %428 = vst.msk [vmem:[#allocation3 + $0x8] sm:$0xff] %vm313_vm1, %v389_v17  ;;  %403 = vperm.xlu1 %809, %v389_v17   ;;  %v391_v18 = vsub.f32 %v380_v15, %v389_v17 }
 0x131   : > { %v394_v20 = vmul.f32 1.442695, %v391_v18 }
 0x133   : > { %811 = vpow2.f32 %v394_v20 }
 0x134   : > { %v384_v21 = vpop.xlane.xlu0 %383 }
 0x135   : > { %v388_v22 = vmax.f32 %v379_v19, %v384_v21 }
 0x137   : > { %v390_v23 = vsub.f32 %v379_v19, %v388_v22  ;;  %427 = vst.msk [vmem:[#allocation3] sm:$0xff] %vm313_vm1, %v388_v22  ;;  %398 = vperm.xlu1 %809, %v388_v22  }
 0x139   : > { %v392_v24 = vmul.f32 1.442695, %v390_v23  ;;  %v812_v25 = vpop.eup %811 }
 0x13a   : > { %v415_v45 = vmul.f32 %v812_v25, %v413_v43 }
 0x13b   : > { %813 = vpow2.f32 %v392_v24 }
 0x13f   : > { %464 = vperm.xlu1 %809, %v812_v25  }
 0x141   : > { %v814_v26 = vpop.eup %813 }
 0x142   : > { %432 = vperm.xlu0 %810, %v814_v26   ;;  %v414_v40 = vmul.f32 %v814_v26, %v412_v39 }
 0x1a1   : > { %v404_v29 = vpop.permute.xlu1 %403 }
 0x1a2   : > { %v407_v30 = vsub.f32 %v376_v9, %v404_v29 }
 0x1a4   : > { %v410_v31 = vmul.f32 1.442695, %v407_v30 }
 0x1a6   : > { %815 = vpow2.f32 %v410_v31 }
 0x1a9   : > { %v399_v32 = vpop.permute.xlu1 %398 }
 0x1aa   : > { %v406_v33 = vsub.f32 %v350_v11, %v399_v32 }
 0x1ac   : > { %v816_v34 = vpop.eup %815  ;;  %v408_v35 = vmul.f32 1.442695, %v406_v33 }
 0x1ad   : > { %723 = vmatmul.msk.f32.vlgmr.msra.gmra.mxu3 %vm381_vm2, %v816_v34  ;;  %v419_v38 = vsel %vm381_vm2, %v816_v34, 0.0 }
 0x1ae   : > { %817 = vpow2.f32 %v408_v35 }
 0x1b1   : > { %v465_v12 = vpop.permute.xlu1 %464 }
 0x1b4   : > { %v818_v36 = vpop.eup %817  ;;  %v433_v50 = vpop.permute.xlu0 %432 }
 0x1b5   : > { %722 = vmatmul.msk.f32.vlgmr.msra.gmra.mxu2 %vm381_vm2, %v818_v36  ;;  %v416_v37 = vsel %vm381_vm2, %v818_v36, 0.0  ;;  %v435_v51 = vmul.f32 %v433_v50, %v429_v49 }
 0x1b6   : > { %417 = vadd.xlane.f32.xlu2 %v416_v37 }
 0x1be   : > { %420 = vadd.xlane.f32.xlu2 %v419_v38 }
 0x229   : > { %v418_v41 = vpop.xlane.xlu2 %417 }
 0x22a   : > { %v422_v42 = vadd.f32 %v418_v41, %v414_v40 }
 0x22c   : > { %425 = vst.msk [vmem:[#allocation4] sm:$0xff] %vm313_vm1, %v422_v42 }
 0x230   : > { %v488_v44 = vpop.f32.mrf.mxu3 }
 0x231   : > { %492 = vrot.lane.b32.xlu2 %v488_v44, %s1006_s24  ;;  %v421_v46 = vpop.xlane.xlu2 %420 }
 0x232   : > { %v423_v47 = vadd.f32 %v421_v46, %v415_v45 }
 0x233   : > { %v501_v48 = vld [vmem:[#allocation4] sm:$0xff] }
 0x234   : > { %426 = vst.msk [vmem:[#allocation4 + $0x8] sm:$0xff] %vm313_vm1, %v423_v47  ;;  %819 = vrcp.f32 %v501_v48  ;;  %v514_v58 = vand.u32 2147483648, %v501_v48  ;;  %v512_v60 = vand.u32 2147483647, %v501_v48  ;;  %vm508_vm5 = vweird.f32 %v501_v48 }
 0x236   : > { %v515_v63 = vor.u32 1.1754944e-38, %v514_v58  ;;  %vm513_vm7 = vcmp.eq.f32.partialorder %v512_v60, 8.507059e+37 }
 0x238   : > { %v456_v52 = vpop.f32.mrf.mxu2 }
 0x239   : > { %v459_v53 = vadd.f32 %v456_v52, %v435_v51 }
 0x23a   : > { %v820_v54 = vpop.eup %819 }
 0x23b   : > { %460 = vst.msk [vmem:[#allocation5] sm:$0xff] %vm310_vm0, %v459_v53  ;;  %v504_v55 = vmul.f32 %v820_v54, %v501_v48  ;;  %v502_v56 = vld [vmem:[#allocation4 + $0x8] sm:$0xff]  ;;  %vm509_vm4 = vweird.f32 %v820_v54 }
 0x23c   : > { %821 = vrcp.f32 %v502_v56  ;;  %vm510_vm6 = vmor %vm508_vm5, %vm509_vm4  ;;  %v529_v4 = vand.u32 2147483648, %v502_v56  ;;  %v527_v6 = vand.u32 2147483647, %v502_v56  ;;  %vm523_vm9 = vweird.f32 %v502_v56 }
 0x23d   : > { %v505_v57 = vsub.f32 1.0, %v504_v55 }
 0x23e   : > { %v530_v8 = vor.u32 1.1754944e-38, %v529_v4  ;;  %vm528_vm11 = vcmp.eq.f32.partialorder %v527_v6, 8.507059e+37 }
 0x23f   : > { %v506_v59 = vmul.f32 %v820_v54, %v505_v57 }
 0x241   : > { %v507_v61 = vadd.f32 %v820_v54, %v506_v59 }
 0x242   : > { %v822_v62 = vpop.eup %821  ;;  %v461_v11 = vld [vmem:[#allocation5] sm:$0xff] }
 0x243   : > { %v511_v0 = vsel %vm510_vm6, %v820_v54, %v507_v61  ;;  %v519_v1 = vmul.f32 %v822_v62, %v502_v56  ;;  %vm524_vm8 = vweird.f32 %v822_v62  ;;  %v467_v13 = vmul.f32 %v465_v12, %v461_v11 }
 0x244   : > { %v516_v2 = vsel %vm513_vm7, %v515_v63, %v511_v0  ;;  %vm525_vm10 = vmor %vm523_vm9, %vm524_vm8 }
 0x245   : > { %536 = vperm.xlu1 %809, %v516_v2   ;;  %v520_v3 = vsub.f32 1.0, %v519_v1 }
 0x247   : > { %v521_v5 = vmul.f32 %v822_v62, %v520_v3 }
 0x249   : > { %v522_v7 = vadd.f32 %v822_v62, %v521_v5 }
 0x24b   : > { %v526_v9 = vsel %vm525_vm10, %v822_v62, %v522_v7 }
 0x24c   : > { %v531_v10 = vsel %vm528_vm11, %v530_v8, %v526_v9 }
 0x24d   : > { %544 = vperm.xlu1 %809, %v531_v10  }
 0x28b   : > { %v493_v14 = vpop.permute.xlu2 %492 }
 0x28c   : > { %v495_v15 = vadd.f32 %v493_v14, %v467_v13 }
 0x28e   : > { %497 = vst.msk [vmem:[#allocation5] sm:$0xff] %vm496_vm12, %v495_v15 }
 0x295   : > { %v533_v16 = vld [vmem:[#allocation5] sm:$0xff] }
 0x2b7   : > { %v537_v17 = vpop.permute.xlu1 %536 }
 0x2b8   : > { %v539_v18 = vmul.f32 %v537_v17, %v533_v16 }
 0x2ba   : > { %540 = vst.msk [vmem:[#allocation5] sm:$0xff] %vm310_vm0, %v539_v18 }
 0x2bf   : > { %v545_v20 = vpop.permute.xlu1 %544 }
 0x2c1   : > { %v541_v19 = vld [vmem:[#allocation5] sm:$0xff] }
 0x2c2   : > { %v547_v21 = vmul.f32 %v545_v20, %v541_v19 }
 0x2c4   : > { %548 = vst.msk [vmem:[#allocation5] sm:$0xff] %vm496_vm12, %v547_v21 }
 0x2cb   : > { %v549_v22 = vld [vmem:[#allocation5] sm:$0xff] }
 0x2cc   : > { %551 = vst.msk [vmem:[%s301_s22] sm:$0xff] %vm318_vm3, %v549_v22 }
 0x2cd   : > { %940 = shalt.err (!%p937_p13)
}
 0x2ce   : > { %737 = dma.vmem_to_hbm [thread:$0]  (%p1082_p9), %s567_s23, 128, %s569_s6, %s553_s7  }
 0x2cf PF: > { %s1236_s1 = sld [smem:[#allocation18_spill]]  ;;  %s580_s28 = sand.u32 1, %s979_s12  }
 0x2d0   : > { %p750_p0 = pnand %p703_p12, %p1089_p11  ;;  %s581_s16 = scalar_lea.sflag [#allocation8], %s580_s28 }
 0x2d2   : > { %p751_p1 = pneg %p750_p0 }
 0x2d4   : > { %974 = dma.done.wait (%p751_p1), %s581_s16, 128  }
 0x2d5   : > { %976 = vsyncadd (%p751_p1), %s581_s16, 4294967168  ;;  %s22_s17 = sadd.s32 1, %s1236_s1   ;;  %s1237_s14 = sld [smem:[#allocation16_spill]] }
 0x2d6   : > { %p19_p2 = scmp.ge.s32.totalorder %s22_s17, 4   ;;  %s1238_s26 = sld [smem:[#allocation20_spill]] }
 0x2d7   : > { %s1239_s15 = sld [smem:[#allocation17_spill]]  ;;  %s1241_s12 = smov %s983_s13 }
 0x2d8   : > { %s1240_s16 = sld [smem:[#allocation19_spill]]  ;;  %21 = sbr.rel (!%p19_p2) target bundleno = 10 (0xa), region = 109 }
 0x2db   : > { %s1242_s13 = smov %s1237_s14 }
 0x2dc   : > { %s1243_s14 = smov %s1238_s26 }
 0x2dd   :  { %587 = vsyncpa [#allocation7], 1 }
 0x2de   :  { %589 = vsyncpa [#allocation7 + $0x1], 1 }
 0x2df   :  { %590 = vsyncpa [#allocation10], 1 }
 0x2e0   :  { %592 = vsyncpa [#allocation10 + $0x1], 1 }
 0x2e1   :  { %593 = vsyncpa [#allocation8], 1 }
 0x2e2   :  { %595 = vsyncpa [#allocation8 + $0x1], 1 }

</bundles_post_ra>
